<compile_context>
chip_gen: v5e
topology: v5e:2x2
jax: 0.10.0
libtpu: 0.0.40
codegen_flags: <defaults>
</compile_context>

<pallas_src>
import jax
import jax.numpy as jnp
from jax.experimental import pallas as pl
from jax.experimental.pallas import tpu as pltpu


def _copy_kernel(x_ref, o_ref):
    # IDConv.forward(x, *args) -> x : straight copy of the (lane-dense) tile.
    o_ref[...] = x_ref[...]


def _choose_lane_width(total):
    # Largest lane width (multiple of 128) that evenly divides the element
    # count; lane-dense stores are the biggest single perf lever.
    for lanes in (1024, 512, 256, 128):
        if total % lanes == 0:
            return lanes
    return None


def id_conv(x, *args):
    """Pallas implementation of IDConv: returns x unchanged.

    x: [N, C, H, W] (any dtype). Extra *args of the PyTorch forward are
    ignored (they are ignored there too).
    """
    del args  # ignored, exactly like the PyTorch module
    orig_shape = x.shape
    total = x.size

    lanes = _choose_lane_width(total)
    if lanes is None:
        # Fallback for awkward sizes: one full-extent block (block == full
        # array dims, so the (8,128) divisibility rule does not apply).
        rows, lanes = 1, total
        tile_rows = 1
        x2 = x.reshape(rows, lanes)
    else:
        rows = total // lanes
        bytes_per_row = lanes * x.dtype.itemsize
        # Cap the tile payload at ~2 MiB: with input+output double buffering
        # that is <= 8 MiB of VMEM, comfortably inside the scoped default on
        # v5e (16 MiB), v6e (32 MiB) and v7x (32 MiB of 64 MiB physical).
        max_tile_rows = max(32, (2 * 1024 * 1024) // bytes_per_row)
        if rows <= max_tile_rows:
            tile_rows = rows  # single grid step, block == full array dims
        else:
            # Keep the row tile aligned to 32 so the sublane min-tile rule is
            # met for every dtype down to 8-bit.
            tile_rows = max(32, (max_tile_rows // 32) * 32)
        x2 = x.reshape(rows, lanes)

    grid = (pl.cdiv(rows, tile_rows),)

    out = pl.pallas_call(
        _copy_kernel,
        out_shape=jax.ShapeDtypeStruct((rows, lanes), x.dtype),
        grid=grid,
        in_specs=[pl.BlockSpec((tile_rows, lanes), lambda i: (i, 0))],
        out_specs=pl.BlockSpec((tile_rows, lanes), lambda i: (i, 0)),
        input_output_aliases={0: 0},
        compiler_params=pltpu.CompilerParams(
            dimension_semantics=("parallel",),
        ),
    )(x2)

    return out.reshape(orig_shape)


if __name__ == "__main__":
    key = jax.random.PRNGKey(0)
    x = jax.random.normal(key, (2, 4, 16, 16), dtype=jnp.float32)

    y = id_conv(x)
    jax.block_until_ready(y)

    assert y.shape == x.shape
    assert y.dtype == x.dtype
    assert bool(jnp.all(y == x))
    print("KERNEL_OK")
</pallas_src>

<mosaic_0001>
module attributes {stable_mosaic.version = 11 : i64} {
  func.func @_copy_kernel(%arg0: i32, %arg1: memref<2x1024xf32, #tpu.memory_space<vmem>>, %arg2: memref<2x1024xf32, #tpu.memory_space<vmem>>) attributes {dimension_semantics = [#tpu.dimension_semantics<parallel>], iteration_bounds = array<i64: 1>, scalar_prefetch = 0 : i64, scratch_operands = 0 : i64, tpu.core_type = #tpu.core_type<tc>, window_params = [{transform_indices = @transform_0, window_bounds = array<i64: 2, 1024>}, {transform_indices = @transform_1, window_bounds = array<i64: 2, 1024>}]} {
    %c0 = arith.constant 0 : index
    %c0_0 = arith.constant 0 : index
    %0 = vector.load %arg1[%c0, %c0_0] : memref<2x1024xf32, #tpu.memory_space<vmem>>, vector<2x1024xf32>
    %c0_1 = arith.constant 0 : index
    %c0_2 = arith.constant 0 : index
    %1 = vector.load %arg2[%c0_1, %c0_2] : memref<2x1024xf32, #tpu.memory_space<vmem>>, vector<2x1024xf32>
    tpu.vector_store %arg2[%c0_1, %c0_2], %0 {strides = array<i32>} : memref<2x1024xf32, #tpu.memory_space<vmem>>, vector<2x1024xf32>,
    return
  }
  func.func @transform_0(%arg0: i32) -> (i32, i32) {
    %c0_i32 = arith.constant 0 : i32
    %c0_i32_0 = arith.constant 0 : i32
    return %arg0, %c0_i32 : i32, i32
  }
  func.func @transform_1(%arg0: i32) -> (i32, i32) {
    %c0_i32 = arith.constant 0 : i32
    %c0_i32_0 = arith.constant 0 : i32
    return %arg0, %c0_i32 : i32, i32
  }
}

</mosaic_0001>

<bundles_post_ra>
// kernel: tpu_custom_call.1
= control target key start
LH: loop header
LB: loop body
LE: loop exit
PB: predicated region body
PF: predicated region fallthrough
CT: control target
= control target key end

     0   :  { %6 = vsyncpa [#allocation3], 0  ;;  %s116_s0 = inlined_call_operand.hbm [shape: f32[2,1024], index: 0, kind: input, shape index: {}, may-alias: {0,1}]   ;;  %s117_s1 = inlined_call_operand.hbm [shape: f32[2,1024], index: 1, kind: output, shape index: {}, may-alias: {0,1}]  }
   0x1   :  { %7 = vsyncpa [#allocation4], 0  ;;  %s13_s8 = sshll.u32 %s116_s0, 4  ;;  %s98_s9 = smov [#allocation2]   ;;  %s14_s8 = int_to_ptr.hbm [resolvable:$true] %s13_s8 }
   0x2   :  { %s15_s10 = sshll.u32 %s98_s9, 4  ;;  %s16_s10 = int_to_ptr.vmem [resolvable:$true] %s15_s10 }
   0x3   :  { %18 = dma.hbm_to_vmem [thread:$0]  %s14_s8, 256, %s16_s10, [#allocation3]  }
   0x4   :  { %94 = dma.done.wait [#allocation3], 256  }
   0x5   :  { %95 = vsyncadd [#allocation3], 4294967040  ;;  %s99_s11 = smov [#allocation5]   ;;  %s34_s15 = sshll.u32 %s117_s1, 4  ;;  %v23_v0 = vld [vmem:[#allocation2] sm:$0xff]  ;;  %v24_v1 = vld [vmem:[#allocation2 + $0x8] sm:$0xff]  ;;  %s35_s15 = int_to_ptr.hbm [resolvable:$true] %s34_s15 }
   0x6   :  { %s32_s12 = sshll.u32 %s99_s11, 4  ;;  %25 = vst [vmem:[#allocation5] sm:$0xff] %v23_v0  ;;  %s33_s12 = int_to_ptr.vmem [resolvable:$true] %s32_s12 }
   0x7   :  { %26 = vst [vmem:[#allocation5 + $0x8] sm:$0xff] %v24_v1 }
   0x8   :  { %37 = dma.vmem_to_hbm [thread:$0]  %s33_s12, 256, %s35_s15, [#allocation4]  }
   0x9   :  { %96 = dma.done.wait [#allocation4], 256  }
   0xa   :  { %97 = vsyncadd [#allocation4], 4294967040 }
   0xb   :  { %42 = vsyncpa [#allocation3], 1 }
   0xc   :  { %43 = vsyncpa [#allocation4], 1 }

</bundles_post_ra>
